<compile_context>
chip_gen: v7x
topology: tpu7x:2x2x1
jax: 0.10.0
libtpu: 0.0.40
codegen_flags: <defaults>
</compile_context>

<pallas_src>
import functools

import jax
import jax.numpy as jnp
from jax.experimental import pallas as pl
from jax.experimental.pallas import tpu as pltpu

LANE = 128
BF16_SUBLANES = 16   # a bf16 vreg packs 16 sublanes


def _round_up(x, m):
    return pl.cdiv(x, m) * m


def bidir_rnn_fc_kernel(x_ref,        # (T, Bblk, Ep)   bf16
                        wih_ref,      # (Ep, W2)        bf16  [wih_f.T | wih_b.T] packed
                        brnn_ref,     # (1, W2)         f32   [b_ih_f+b_hh_f | b_ih_b+b_hh_b]
                        whh_ref,      # (W2, W2)        bf16  block-diag(whh_f.T, whh_b.T)
                        wfc_ref,      # (W2, LANE)      bf16  fc weight in column 0
                        bfc_ref,      # (1, LANE)       f32   fc bias in column 0
                        out_ref,      # (Bblk, LANE)    f32   logits in column 0
                        xsteps_ref,   # (T, Bblk, W2)   f32   VMEM scratch
                        *, off_b):
    T, Bblk, Ep = x_ref.shape
    W2 = whh_ref.shape[0]

    # ---- Hoisted input projection: one lane-dense (T*Bblk, Ep) @ (Ep, W2)
    # bf16 matmul covers both directions; folded RNN biases added here.
    x2d = x_ref[...].reshape(T * Bblk, Ep)
    xproj = jnp.dot(x2d, wih_ref[...], preferred_element_type=jnp.float32)
    xproj = (xproj + brnn_ref[...]).reshape(T, Bblk, W2)

    # ---- Stage per-step recurrence inputs ONCE: forward lanes [:off_b] read
    # time t, backward lanes [off_b:] read time T-1-t.  One vselect per step,
    # entirely off the serial h-chain; the recurrence body below is just
    # static slice + dot + add + tanh.
    lane = jax.lax.broadcasted_iota(jnp.int32, (Bblk, W2), 1)
    fwd_mask = lane < off_b
    for t in range(T):
        xsteps_ref[t] = jnp.where(fwd_mask, xproj[t], xproj[T - 1 - t])

    whh = whh_ref[...]                          # bf16, stays vreg-resident
    h0 = jnp.zeros((Bblk, W2), jnp.float32)     # fused carry [hf | hb]

    # TODO(synk): for large H, drive W_hh weight-stationary via
    # pltpu.matmul_push_rhs / matmul_acc_lhs / matmul_pop (and split the
    # block-diagonal into two 128-deep matmuls on v5e when 2*H > 128).
    def step(t, h):
        z = xsteps_ref[t] + jnp.dot(h.astype(jnp.bfloat16), whh,
                                    preferred_element_type=jnp.float32)
        return jnp.tanh(z)

    if T <= 16:
        # Small T: full unroll -> maximum LLO scheduler visibility.
        h = h0
        for t in range(T):
            h = step(t, h)
    else:
        # Larger T: bounded chunked unroll so vreg live ranges stay bounded.
        h = jax.lax.fori_loop(0, T, step, h0, unroll=8)

    # ---- Final FC (dropout is identity at eval).  Carry is already [hf|hb]
    # in packed lanes, so no concatenate; bf16 MXU pass, f32 accumulation;
    # lane-dense output block -> unmasked stores.
    out_ref[...] = (jnp.dot(h.astype(jnp.bfloat16), wfc_ref[...],
                            preferred_element_type=jnp.float32)
                    + bfc_ref[...])


def sentiment_rnn_forward(tokens, params):
    """tokens: (B, T) int32. Returns (B,) float32 logits."""
    emb = params["embedding"]                       # (V, E) f32
    B, T = tokens.shape
    E = emb.shape[1]
    H = params["w_hh_f"].shape[0]

    Ep = _round_up(E, LANE)
    # Pack both directions into a single 128-lane group when they fit:
    # halves the per-step contraction depth, cuts W_hh VMEM/vreg 4x.
    if 2 * H <= LANE:
        W2, off_b = LANE, H
    else:
        Hp = _round_up(H, LANE)
        W2, off_b = 2 * Hp, Hp

    # Batch tile: multiple of 16 (bf16 sublane packing), capped at 128, split
    # into >=2 grid steps when B allows so both v7x TensorCores get work.
    batch_block = _round_up(B, BF16_SUBLANES)
    if batch_block > BF16_SUBLANES:
        batch_block = max(BF16_SUBLANES,
                          _round_up(pl.cdiv(batch_block, 2), BF16_SUBLANES))
    batch_block = min(batch_block, 128)
    Bp = _round_up(B, batch_block)

    # --- Embedding gather in bf16 + a single transpose-and-pad write.
    # TODO(synk): for large T*B move the gather in-kernel (token ids in SMEM
    # via PrefetchScalarGridSpec + pl.Element BlockSpec on the table).
    xe = jnp.take(emb.astype(jnp.bfloat16), tokens, axis=0)          # (B, T, E)
    x_pad = jnp.zeros((T, Bp, Ep), jnp.bfloat16)
    x_pad = x_pad.at[:, :B, :E].set(jnp.transpose(xe, (1, 0, 2)))    # (T, Bp, Ep)

    # --- Fused input-projection weight [wih_f.T | wih_b.T], packed lanes, bf16.
    wih = jnp.zeros((Ep, W2), jnp.bfloat16)
    wih = wih.at[:E, :H].set(params["w_ih_f"].T.astype(jnp.bfloat16))
    wih = wih.at[:E, off_b:off_b + H].set(params["w_ih_b"].T.astype(jnp.bfloat16))

    # --- Folded RNN biases (b_ih + b_hh) for both directions, f32.
    brnn = jnp.zeros((1, W2), jnp.float32)
    brnn = brnn.at[0, :H].set(params["b_ih_f"] + params["b_hh_f"])
    brnn = brnn.at[0, off_b:off_b + H].set(params["b_ih_b"] + params["b_hh_b"])

    # --- Block-diagonal hidden->hidden weight: one fused matmul per timestep.
    whh = jnp.zeros((W2, W2), jnp.bfloat16)
    whh = whh.at[:H, :H].set(params["w_hh_f"].T.astype(jnp.bfloat16))
    whh = whh.at[off_b:off_b + H, off_b:off_b + H].set(
        params["w_hh_b"].T.astype(jnp.bfloat16))

    # --- FC weight (bf16, lane-dense, real values in column 0) and bias (f32).
    wfc = jnp.zeros((W2, LANE), jnp.bfloat16)
    wfc = wfc.at[:H, 0].set(params["w_fc"][0, :H].astype(jnp.bfloat16))
    wfc = wfc.at[off_b:off_b + H, 0].set(params["w_fc"][0, H:].astype(jnp.bfloat16))
    bfc = jnp.zeros((1, LANE), jnp.float32)
    bfc = bfc.at[0, 0].set(params["b_fc"][0])

    # --- Explicit VMEM budget (x block is double-buffered by the pipeline).
    x_blk = 2 * (T * batch_block * Ep * 2)
    w_blk = 2 * ((Ep * W2 + W2 * W2 + W2 * LANE) * 2 + (W2 + LANE) * 4)
    scr = T * batch_block * W2 * 4
    out_blk = 2 * batch_block * LANE * 4
    vmem_limit = int(min(max(x_blk + w_blk + scr + out_blk + (4 << 20), 32 << 20),
                         100 << 20))
    # TODO(synk): for long T, time-chunk x with an inner pltpu.emit_pipeline
    # (h carried in scratch) so the (T, batch_block, Ep) block never has to be
    # fully VMEM-resident (v7x has only 64 MiB physical VMEM).

    grid = (Bp // batch_block,)
    out = pl.pallas_call(
        functools.partial(bidir_rnn_fc_kernel, off_b=off_b),
        out_shape=jax.ShapeDtypeStruct((Bp, LANE), jnp.float32),
        grid_spec=pltpu.PrefetchScalarGridSpec(
            num_scalar_prefetch=0,
            grid=grid,
            in_specs=[
                # activations: tiled over batch
                pl.BlockSpec((T, batch_block, Ep), lambda b: (0, b, 0)),
                # weights: constant index maps -> DMA'd once, VMEM-resident
                pl.BlockSpec((Ep, W2), lambda b: (0, 0)),
                pl.BlockSpec((1, W2), lambda b: (0, 0)),
                pl.BlockSpec((W2, W2), lambda b: (0, 0)),
                pl.BlockSpec((W2, LANE), lambda b: (0, 0)),
                pl.BlockSpec((1, LANE), lambda b: (0, 0)),
            ],
            out_specs=pl.BlockSpec((batch_block, LANE), lambda b: (b, 0)),
            scratch_shapes=[pltpu.VMEM((T, batch_block, W2), jnp.float32)],
        ),
        compiler_params=pltpu.CompilerParams(
            dimension_semantics=("parallel",),
            vmem_limit_bytes=vmem_limit),
    )(x_pad, wih, brnn, whh, wfc, bfc)

    return out[:B, 0]                                            # .squeeze()


def sentiment_rnn_reference(tokens, params):
    """Pure-JAX f32 reference mirroring the PyTorch forward (eval mode)."""
    xe = jnp.take(params["embedding"], tokens, axis=0).astype(jnp.float32)  # (B,T,E)
    B, T, _ = xe.shape
    H = params["w_hh_f"].shape[0]

    def run_dir(xseq, w_ih, w_hh, b_ih, b_hh):
        h = jnp.zeros((B, H), jnp.float32)
        for t in range(T):
            h = jnp.tanh(xseq[:, t, :] @ w_ih.T + b_ih + h @ w_hh.T + b_hh)
        return h

    hf = run_dir(xe, params["w_ih_f"], params["w_hh_f"],
                 params["b_ih_f"], params["b_hh_f"])
    hb = run_dir(xe[:, ::-1, :], params["w_ih_b"], params["w_hh_b"],
                 params["b_ih_b"], params["b_hh_b"])
    hn = jnp.concatenate([hf, hb], axis=1)
    return (hn @ params["w_fc"].T + params["b_fc"])[:, 0]


def init_params(key, vocab_size, embed_dim, hidden_dim):
    ks = jax.random.split(key, 10)
    k = 1.0 / jnp.sqrt(hidden_dim)
    u = lambda kk, shape: jax.random.uniform(kk, shape, jnp.float32, -k, k)
    emb = jax.random.normal(ks[0], (vocab_size, embed_dim), jnp.float32)
    emb = emb.at[0].set(0.0)  # padding_idx=0
    return {
        "embedding": emb,
        "w_ih_f": u(ks[1], (hidden_dim, embed_dim)),
        "w_hh_f": u(ks[2], (hidden_dim, hidden_dim)),
        "b_ih_f": u(ks[3], (hidden_dim,)),
        "b_hh_f": u(ks[4], (hidden_dim,)),
        "w_ih_b": u(ks[5], (hidden_dim, embed_dim)),
        "w_hh_b": u(ks[6], (hidden_dim, hidden_dim)),
        "b_ih_b": u(ks[7], (hidden_dim,)),
        "b_hh_b": u(ks[8], (hidden_dim,)),
        "w_fc": u(ks[9], (1, 2 * hidden_dim)),
        "b_fc": jnp.zeros((1,), jnp.float32),
    }


if __name__ == "__main__":
    VOCAB, EMBED, HIDDEN = 50, 16, 32
    B, T = 2, 8

    key = jax.random.PRNGKey(0)
    kp, kt = jax.random.split(key)
    params = init_params(kp, VOCAB, EMBED, HIDDEN)
    tokens = jax.random.randint(kt, (B, T), 0, VOCAB, dtype=jnp.int32)

    out = jax.block_until_ready(sentiment_rnn_forward(tokens, params))
    ref = jax.block_until_ready(sentiment_rnn_reference(tokens, params))

    assert out.shape == (B,), out.shape
    # bf16 activations / RNN / FC weights (f32 accumulation) -> loose tolerance.
    assert jnp.allclose(out, ref, atol=5e-2, rtol=5e-2), (out, ref)
    print("KERNEL_OK")
</pallas_src>

<mosaic_0001>
module attributes {stable_mosaic.version = 11 : i64} {
  func.func @bidir_rnn_fc_kernel(%arg0: i32, %arg1: memref<8x16x128xbf16, #tpu.memory_space<vmem>>, %arg2: memref<128x128xbf16, #tpu.memory_space<vmem>>, %arg3: memref<1x128xf32, #tpu.memory_space<vmem>>, %arg4: memref<128x128xbf16, #tpu.memory_space<vmem>>, %arg5: memref<128x128xbf16, #tpu.memory_space<vmem>>, %arg6: memref<1x128xf32, #tpu.memory_space<vmem>>, %arg7: memref<16x128xf32, #tpu.memory_space<vmem>>, %arg8: memref<8x16x128xf32, #tpu.memory_space<vmem>>) attributes {dimension_semantics = [#tpu.dimension_semantics<parallel>], iteration_bounds = array<i64: 1>, scalar_prefetch = 0 : i64, scratch_operands = 1 : i64, tpu.core_type = #tpu.core_type<tc>, window_params = [{transform_indices = @transform_0, window_bounds = array<i64: 8, 16, 128>}, {pipeline_mode = #tpu.pipeline_mode<synchronous>, transform_indices = @transform_1, window_bounds = array<i64: 128, 128>}, {pipeline_mode = #tpu.pipeline_mode<synchronous>, transform_indices = @transform_2, window_bounds = array<i64: 1, 128>}, {pipeline_mode = #tpu.pipeline_mode<synchronous>, transform_indices = @transform_3, window_bounds = array<i64: 128, 128>}, {pipeline_mode = #tpu.pipeline_mode<synchronous>, transform_indices = @transform_4, window_bounds = array<i64: 128, 128>}, {pipeline_mode = #tpu.pipeline_mode<synchronous>, transform_indices = @transform_5, window_bounds = array<i64: 1, 128>}, {transform_indices = @transform_6, window_bounds = array<i64: 16, 128>}]} {
    %c0 = arith.constant 0 : index
    %c0_0 = arith.constant 0 : index
    %c0_1 = arith.constant 0 : index
    %0 = vector.load %arg1[%c0, %c0_0, %c0_1] : memref<8x16x128xbf16, #tpu.memory_space<vmem>>, vector<8x16x128xbf16>
    %1 = vector.shape_cast %0 : vector<8x16x128xbf16> to vector<128x128xbf16>
    %c0_2 = arith.constant 0 : index
    %c0_3 = arith.constant 0 : index
    %2 = vector.load %arg2[%c0_2, %c0_3] : memref<128x128xbf16, #tpu.memory_space<vmem>>, vector<128x128xbf16>
    %cst = arith.constant dense<0.000000e+00> : vector<128x128xf32>
    %3 = tpu.matmul %1, %2, %cst {dimension_numbers = #tpu.dot_dimension_numbers<[1], [0], [0], [1], [0, 0, 1, 1], [], []>} : vector<128x128xbf16>, vector<128x128xbf16>, vector<128x128xf32> -> vector<128x128xf32>
    %c0_4 = arith.constant 0 : index
    %c0_5 = arith.constant 0 : index
    %4 = vector.load %arg3[%c0_4, %c0_5] : memref<1x128xf32, #tpu.memory_space<vmem>>, vector<1x128xf32>
    %5 = vector.broadcast %4 : vector<1x128xf32> to vector<128x128xf32>
    %6 = arith.addf %3, %5 : vector<128x128xf32>
    %7 = vector.shape_cast %6 : vector<128x128xf32> to vector<8x16x128xf32>
    %8 = tpu.iota {dimensions = array<i32: 1>} : vector<16x128xi32>
    %c32_i32 = arith.constant 32 : i32
    %9 = vector.broadcast %c32_i32 : i32 to vector<16x128xi32>
    %10 = arith.cmpi slt, %8, %9 : vector<16x128xi32>
    %11 = vector.extract_strided_slice %7 {offsets = [0, 0, 0], sizes = [1, 16, 128], strides = [1, 1, 1]} : vector<8x16x128xf32> to vector<1x16x128xf32>
    %12 = vector.shape_cast %11 : vector<1x16x128xf32> to vector<16x128xf32>
    %13 = vector.extract_strided_slice %7 {offsets = [7, 0, 0], sizes = [1, 16, 128], strides = [1, 1, 1]} : vector<8x16x128xf32> to vector<1x16x128xf32>
    %14 = vector.shape_cast %13 : vector<1x16x128xf32> to vector<16x128xf32>
    %15 = arith.select %10, %12, %14 : vector<16x128xi1>, vector<16x128xf32>
    %c0_6 = arith.constant 0 : index
    %c0_7 = arith.constant 0 : index
    %c0_8 = arith.constant 0 : index
    %16 = vector.load %arg8[%c0_6, %c0_7, %c0_8] : memref<8x16x128xf32, #tpu.memory_space<vmem>>, vector<1x16x128xf32>
    %17 = vector.shape_cast %16 : vector<1x16x128xf32> to vector<16x128xf32>
    %18 = vector.shape_cast %15 : vector<16x128xf32> to vector<1x16x128xf32>
    tpu.vector_store %arg8[%c0_6, %c0_7, %c0_8], %18 {strides = array<i32>} : memref<8x16x128xf32, #tpu.memory_space<vmem>>, vector<1x16x128xf32>,
    %19 = vector.extract_strided_slice %7 {offsets = [1, 0, 0], sizes = [1, 16, 128], strides = [1, 1, 1]} : vector<8x16x128xf32> to vector<1x16x128xf32>
    %20 = vector.shape_cast %19 : vector<1x16x128xf32> to vector<16x128xf32>
    %21 = vector.extract_strided_slice %7 {offsets = [6, 0, 0], sizes = [1, 16, 128], strides = [1, 1, 1]} : vector<8x16x128xf32> to vector<1x16x128xf32>
    %22 = vector.shape_cast %21 : vector<1x16x128xf32> to vector<16x128xf32>
    %23 = arith.select %10, %20, %22 : vector<16x128xi1>, vector<16x128xf32>
    %c1 = arith.constant 1 : index
    %c0_9 = arith.constant 0 : index
    %c0_10 = arith.constant 0 : index
    %24 = vector.load %arg8[%c1, %c0_9, %c0_10] : memref<8x16x128xf32, #tpu.memory_space<vmem>>, vector<1x16x128xf32>
    %25 = vector.shape_cast %24 : vector<1x16x128xf32> to vector<16x128xf32>
    %26 = vector.shape_cast %23 : vector<16x128xf32> to vector<1x16x128xf32>
    tpu.vector_store %arg8[%c1, %c0_9, %c0_10], %26 {strides = array<i32>} : memref<8x16x128xf32, #tpu.memory_space<vmem>>, vector<1x16x128xf32>,
    %27 = vector.extract_strided_slice %7 {offsets = [2, 0, 0], sizes = [1, 16, 128], strides = [1, 1, 1]} : vector<8x16x128xf32> to vector<1x16x128xf32>
    %28 = vector.shape_cast %27 : vector<1x16x128xf32> to vector<16x128xf32>
    %29 = vector.extract_strided_slice %7 {offsets = [5, 0, 0], sizes = [1, 16, 128], strides = [1, 1, 1]} : vector<8x16x128xf32> to vector<1x16x128xf32>
    %30 = vector.shape_cast %29 : vector<1x16x128xf32> to vector<16x128xf32>
    %31 = arith.select %10, %28, %30 : vector<16x128xi1>, vector<16x128xf32>
    %c2 = arith.constant 2 : index
    %c0_11 = arith.constant 0 : index
    %c0_12 = arith.constant 0 : index
    %32 = vector.load %arg8[%c2, %c0_11, %c0_12] : memref<8x16x128xf32, #tpu.memory_space<vmem>>, vector<1x16x128xf32>
    %33 = vector.shape_cast %32 : vector<1x16x128xf32> to vector<16x128xf32>
    %34 = vector.shape_cast %31 : vector<16x128xf32> to vector<1x16x128xf32>
    tpu.vector_store %arg8[%c2, %c0_11, %c0_12], %34 {strides = array<i32>} : memref<8x16x128xf32, #tpu.memory_space<vmem>>, vector<1x16x128xf32>,
    %35 = vector.extract_strided_slice %7 {offsets = [3, 0, 0], sizes = [1, 16, 128], strides = [1, 1, 1]} : vector<8x16x128xf32> to vector<1x16x128xf32>
    %36 = vector.shape_cast %35 : vector<1x16x128xf32> to vector<16x128xf32>
    %37 = vector.extract_strided_slice %7 {offsets = [4, 0, 0], sizes = [1, 16, 128], strides = [1, 1, 1]} : vector<8x16x128xf32> to vector<1x16x128xf32>
    %38 = vector.shape_cast %37 : vector<1x16x128xf32> to vector<16x128xf32>
    %39 = arith.select %10, %36, %38 : vector<16x128xi1>, vector<16x128xf32>
    %c3 = arith.constant 3 : index
    %c0_13 = arith.constant 0 : index
    %c0_14 = arith.constant 0 : index
    %40 = vector.load %arg8[%c3, %c0_13, %c0_14] : memref<8x16x128xf32, #tpu.memory_space<vmem>>, vector<1x16x128xf32>
    %41 = vector.shape_cast %40 : vector<1x16x128xf32> to vector<16x128xf32>
    %42 = vector.shape_cast %39 : vector<16x128xf32> to vector<1x16x128xf32>
    tpu.vector_store %arg8[%c3, %c0_13, %c0_14], %42 {strides = array<i32>} : memref<8x16x128xf32, #tpu.memory_space<vmem>>, vector<1x16x128xf32>,
    %43 = vector.extract_strided_slice %7 {offsets = [4, 0, 0], sizes = [1, 16, 128], strides = [1, 1, 1]} : vector<8x16x128xf32> to vector<1x16x128xf32>
    %44 = vector.shape_cast %43 : vector<1x16x128xf32> to vector<16x128xf32>
    %45 = vector.extract_strided_slice %7 {offsets = [3, 0, 0], sizes = [1, 16, 128], strides = [1, 1, 1]} : vector<8x16x128xf32> to vector<1x16x128xf32>
    %46 = vector.shape_cast %45 : vector<1x16x128xf32> to vector<16x128xf32>
    %47 = arith.select %10, %44, %46 : vector<16x128xi1>, vector<16x128xf32>
    %c4 = arith.constant 4 : index
    %c0_15 = arith.constant 0 : index
    %c0_16 = arith.constant 0 : index
    %48 = vector.load %arg8[%c4, %c0_15, %c0_16] : memref<8x16x128xf32, #tpu.memory_space<vmem>>, vector<1x16x128xf32>
    %49 = vector.shape_cast %48 : vector<1x16x128xf32> to vector<16x128xf32>
    %50 = vector.shape_cast %47 : vector<16x128xf32> to vector<1x16x128xf32>
    tpu.vector_store %arg8[%c4, %c0_15, %c0_16], %50 {strides = array<i32>} : memref<8x16x128xf32, #tpu.memory_space<vmem>>, vector<1x16x128xf32>,
    %51 = vector.extract_strided_slice %7 {offsets = [5, 0, 0], sizes = [1, 16, 128], strides = [1, 1, 1]} : vector<8x16x128xf32> to vector<1x16x128xf32>
    %52 = vector.shape_cast %51 : vector<1x16x128xf32> to vector<16x128xf32>
    %53 = vector.extract_strided_slice %7 {offsets = [2, 0, 0], sizes = [1, 16, 128], strides = [1, 1, 1]} : vector<8x16x128xf32> to vector<1x16x128xf32>
    %54 = vector.shape_cast %53 : vector<1x16x128xf32> to vector<16x128xf32>
    %55 = arith.select %10, %52, %54 : vector<16x128xi1>, vector<16x128xf32>
    %c5 = arith.constant 5 : index
    %c0_17 = arith.constant 0 : index
    %c0_18 = arith.constant 0 : index
    %56 = vector.load %arg8[%c5, %c0_17, %c0_18] : memref<8x16x128xf32, #tpu.memory_space<vmem>>, vector<1x16x128xf32>
    %57 = vector.shape_cast %56 : vector<1x16x128xf32> to vector<16x128xf32>
    %58 = vector.shape_cast %55 : vector<16x128xf32> to vector<1x16x128xf32>
    tpu.vector_store %arg8[%c5, %c0_17, %c0_18], %58 {strides = array<i32>} : memref<8x16x128xf32, #tpu.memory_space<vmem>>, vector<1x16x128xf32>,
    %59 = vector.extract_strided_slice %7 {offsets = [6, 0, 0], sizes = [1, 16, 128], strides = [1, 1, 1]} : vector<8x16x128xf32> to vector<1x16x128xf32>
    %60 = vector.shape_cast %59 : vector<1x16x128xf32> to vector<16x128xf32>
    %61 = vector.extract_strided_slice %7 {offsets = [1, 0, 0], sizes = [1, 16, 128], strides = [1, 1, 1]} : vector<8x16x128xf32> to vector<1x16x128xf32>
    %62 = vector.shape_cast %61 : vector<1x16x128xf32> to vector<16x128xf32>
    %63 = arith.select %10, %60, %62 : vector<16x128xi1>, vector<16x128xf32>
    %c6 = arith.constant 6 : index
    %c0_19 = arith.constant 0 : index
    %c0_20 = arith.constant 0 : index
    %64 = vector.load %arg8[%c6, %c0_19, %c0_20] : memref<8x16x128xf32, #tpu.memory_space<vmem>>, vector<1x16x128xf32>
    %65 = vector.shape_cast %64 : vector<1x16x128xf32> to vector<16x128xf32>
    %66 = vector.shape_cast %63 : vector<16x128xf32> to vector<1x16x128xf32>
    tpu.vector_store %arg8[%c6, %c0_19, %c0_20], %66 {strides = array<i32>} : memref<8x16x128xf32, #tpu.memory_space<vmem>>, vector<1x16x128xf32>,
    %67 = vector.extract_strided_slice %7 {offsets = [7, 0, 0], sizes = [1, 16, 128], strides = [1, 1, 1]} : vector<8x16x128xf32> to vector<1x16x128xf32>
    %68 = vector.shape_cast %67 : vector<1x16x128xf32> to vector<16x128xf32>
    %69 = vector.extract_strided_slice %7 {offsets = [0, 0, 0], sizes = [1, 16, 128], strides = [1, 1, 1]} : vector<8x16x128xf32> to vector<1x16x128xf32>
    %70 = vector.shape_cast %69 : vector<1x16x128xf32> to vector<16x128xf32>
    %71 = arith.select %10, %68, %70 : vector<16x128xi1>, vector<16x128xf32>
    %c7 = arith.constant 7 : index
    %c0_21 = arith.constant 0 : index
    %c0_22 = arith.constant 0 : index
    %72 = vector.load %arg8[%c7, %c0_21, %c0_22] : memref<8x16x128xf32, #tpu.memory_space<vmem>>, vector<1x16x128xf32>
    %73 = vector.shape_cast %72 : vector<1x16x128xf32> to vector<16x128xf32>
    %74 = vector.shape_cast %71 : vector<16x128xf32> to vector<1x16x128xf32>
    tpu.vector_store %arg8[%c7, %c0_21, %c0_22], %74 {strides = array<i32>} : memref<8x16x128xf32, #tpu.memory_space<vmem>>, vector<1x16x128xf32>,
    %c0_23 = arith.constant 0 : index
    %c0_24 = arith.constant 0 : index
    %75 = vector.load %arg4[%c0_23, %c0_24] : memref<128x128xbf16, #tpu.memory_space<vmem>>, vector<128x128xbf16>
    %cst_25 = arith.constant 0.000000e+00 : f32
    %76 = vector.broadcast %cst_25 : f32 to vector<16x128xf32>
    %c0_26 = arith.constant 0 : index
    %c0_27 = arith.constant 0 : index
    %c0_28 = arith.constant 0 : index
    %77 = vector.load %arg8[%c0_26, %c0_27, %c0_28] : memref<8x16x128xf32, #tpu.memory_space<vmem>>, vector<1x16x128xf32>
    %78 = vector.shape_cast %77 : vector<1x16x128xf32> to vector<16x128xf32>
    %79 = arith.truncf %76 : vector<16x128xf32> to vector<16x128xbf16>
    %cst_29 = arith.constant dense<0.000000e+00> : vector<16x128xf32>
    %80 = tpu.matmul %79, %75, %cst_29 {dimension_numbers = #tpu.dot_dimension_numbers<[1], [0], [0], [1], [0, 0, 1, 1], [], []>} : vector<16x128xbf16>, vector<128x128xbf16>, vector<16x128xf32> -> vector<16x128xf32>
    %81 = arith.addf %78, %80 : vector<16x128xf32>
    %82 = math.tanh %81 : vector<16x128xf32>
    %c1_30 = arith.constant 1 : index
    %c0_31 = arith.constant 0 : index
    %c0_32 = arith.constant 0 : index
    %83 = vector.load %arg8[%c1_30, %c0_31, %c0_32] : memref<8x16x128xf32, #tpu.memory_space<vmem>>, vector<1x16x128xf32>
    %84 = vector.shape_cast %83 : vector<1x16x128xf32> to vector<16x128xf32>
    %85 = arith.truncf %82 : vector<16x128xf32> to vector<16x128xbf16>
    %cst_33 = arith.constant dense<0.000000e+00> : vector<16x128xf32>
    %86 = tpu.matmul %85, %75, %cst_33 {dimension_numbers = #tpu.dot_dimension_numbers<[1], [0], [0], [1], [0, 0, 1, 1], [], []>} : vector<16x128xbf16>, vector<128x128xbf16>, vector<16x128xf32> -> vector<16x128xf32>
    %87 = arith.addf %84, %86 : vector<16x128xf32>
    %88 = math.tanh %87 : vector<16x128xf32>
    %c2_34 = arith.constant 2 : index
    %c0_35 = arith.constant 0 : index
    %c0_36 = arith.constant 0 : index
    %89 = vector.load %arg8[%c2_34, %c0_35, %c0_36] : memref<8x16x128xf32, #tpu.memory_space<vmem>>, vector<1x16x128xf32>
    %90 = vector.shape_cast %89 : vector<1x16x128xf32> to vector<16x128xf32>
    %91 = arith.truncf %88 : vector<16x128xf32> to vector<16x128xbf16>
    %cst_37 = arith.constant dense<0.000000e+00> : vector<16x128xf32>
    %92 = tpu.matmul %91, %75, %cst_37 {dimension_numbers = #tpu.dot_dimension_numbers<[1], [0], [0], [1], [0, 0, 1, 1], [], []>} : vector<16x128xbf16>, vector<128x128xbf16>, vector<16x128xf32> -> vector<16x128xf32>
    %93 = arith.addf %90, %92 : vector<16x128xf32>
    %94 = math.tanh %93 : vector<16x128xf32>
    %c3_38 = arith.constant 3 : index
    %c0_39 = arith.constant 0 : index
    %c0_40 = arith.constant 0 : index
    %95 = vector.load %arg8[%c3_38, %c0_39, %c0_40] : memref<8x16x128xf32, #tpu.memory_space<vmem>>, vector<1x16x128xf32>
    %96 = vector.shape_cast %95 : vector<1x16x128xf32> to vector<16x128xf32>
    %97 = arith.truncf %94 : vector<16x128xf32> to vector<16x128xbf16>
    %cst_41 = arith.constant dense<0.000000e+00> : vector<16x128xf32>
    %98 = tpu.matmul %97, %75, %cst_41 {dimension_numbers = #tpu.dot_dimension_numbers<[1], [0], [0], [1], [0, 0, 1, 1], [], []>} : vector<16x128xbf16>, vector<128x128xbf16>, vector<16x128xf32> -> vector<16x128xf32>
    %99 = arith.addf %96, %98 : vector<16x128xf32>
    %100 = math.tanh %99 : vector<16x128xf32>
    %c4_42 = arith.constant 4 : index
    %c0_43 = arith.constant 0 : index
    %c0_44 = arith.constant 0 : index
    %101 = vector.load %arg8[%c4_42, %c0_43, %c0_44] : memref<8x16x128xf32, #tpu.memory_space<vmem>>, vector<1x16x128xf32>
    %102 = vector.shape_cast %101 : vector<1x16x128xf32> to vector<16x128xf32>
    %103 = arith.truncf %100 : vector<16x128xf32> to vector<16x128xbf16>
    %cst_45 = arith.constant dense<0.000000e+00> : vector<16x128xf32>
    %104 = tpu.matmul %103, %75, %cst_45 {dimension_numbers = #tpu.dot_dimension_numbers<[1], [0], [0], [1], [0, 0, 1, 1], [], []>} : vector<16x128xbf16>, vector<128x128xbf16>, vector<16x128xf32> -> vector<16x128xf32>
    %105 = arith.addf %102, %104 : vector<16x128xf32>
    %106 = math.tanh %105 : vector<16x128xf32>
    %c5_46 = arith.constant 5 : index
    %c0_47 = arith.constant 0 : index
    %c0_48 = arith.constant 0 : index
    %107 = vector.load %arg8[%c5_46, %c0_47, %c0_48] : memref<8x16x128xf32, #tpu.memory_space<vmem>>, vector<1x16x128xf32>
    %108 = vector.shape_cast %107 : vector<1x16x128xf32> to vector<16x128xf32>
    %109 = arith.truncf %106 : vector<16x128xf32> to vector<16x128xbf16>
    %cst_49 = arith.constant dense<0.000000e+00> : vector<16x128xf32>
    %110 = tpu.matmul %109, %75, %cst_49 {dimension_numbers = #tpu.dot_dimension_numbers<[1], [0], [0], [1], [0, 0, 1, 1], [], []>} : vector<16x128xbf16>, vector<128x128xbf16>, vector<16x128xf32> -> vector<16x128xf32>
    %111 = arith.addf %108, %110 : vector<16x128xf32>
    %112 = math.tanh %111 : vector<16x128xf32>
    %c6_50 = arith.constant 6 : index
    %c0_51 = arith.constant 0 : index
    %c0_52 = arith.constant 0 : index
    %113 = vector.load %arg8[%c6_50, %c0_51, %c0_52] : memref<8x16x128xf32, #tpu.memory_space<vmem>>, vector<1x16x128xf32>
    %114 = vector.shape_cast %113 : vector<1x16x128xf32> to vector<16x128xf32>
    %115 = arith.truncf %112 : vector<16x128xf32> to vector<16x128xbf16>
    %cst_53 = arith.constant dense<0.000000e+00> : vector<16x128xf32>
    %116 = tpu.matmul %115, %75, %cst_53 {dimension_numbers = #tpu.dot_dimension_numbers<[1], [0], [0], [1], [0, 0, 1, 1], [], []>} : vector<16x128xbf16>, vector<128x128xbf16>, vector<16x128xf32> -> vector<16x128xf32>
    %117 = arith.addf %114, %116 : vector<16x128xf32>
    %118 = math.tanh %117 : vector<16x128xf32>
    %c7_54 = arith.constant 7 : index
    %c0_55 = arith.constant 0 : index
    %c0_56 = arith.constant 0 : index
    %119 = vector.load %arg8[%c7_54, %c0_55, %c0_56] : memref<8x16x128xf32, #tpu.memory_space<vmem>>, vector<1x16x128xf32>
    %120 = vector.shape_cast %119 : vector<1x16x128xf32> to vector<16x128xf32>
    %121 = arith.truncf %118 : vector<16x128xf32> to vector<16x128xbf16>
    %cst_57 = arith.constant dense<0.000000e+00> : vector<16x128xf32>
    %122 = tpu.matmul %121, %75, %cst_57 {dimension_numbers = #tpu.dot_dimension_numbers<[1], [0], [0], [1], [0, 0, 1, 1], [], []>} : vector<16x128xbf16>, vector<128x128xbf16>, vector<16x128xf32> -> vector<16x128xf32>
    %123 = arith.addf %120, %122 : vector<16x128xf32>
    %124 = math.tanh %123 : vector<16x128xf32>
    %125 = arith.truncf %124 : vector<16x128xf32> to vector<16x128xbf16>
    %c0_58 = arith.constant 0 : index
    %c0_59 = arith.constant 0 : index
    %126 = vector.load %arg5[%c0_58, %c0_59] : memref<128x128xbf16, #tpu.memory_space<vmem>>, vector<128x128xbf16>
    %cst_60 = arith.constant dense<0.000000e+00> : vector<16x128xf32>
    %127 = tpu.matmul %125, %126, %cst_60 {dimension_numbers = #tpu.dot_dimension_numbers<[1], [0], [0], [1], [0, 0, 1, 1], [], []>} : vector<16x128xbf16>, vector<128x128xbf16>, vector<16x128xf32> -> vector<16x128xf32>
    %c0_61 = arith.constant 0 : index
    %c0_62 = arith.constant 0 : index
    %128 = vector.load %arg6[%c0_61, %c0_62] : memref<1x128xf32, #tpu.memory_space<vmem>>, vector<1x128xf32>
    %129 = vector.broadcast %128 : vector<1x128xf32> to vector<16x128xf32>
    %130 = arith.addf %127, %129 : vector<16x128xf32>
    %c0_63 = arith.constant 0 : index
    %c0_64 = arith.constant 0 : index
    %131 = vector.load %arg7[%c0_63, %c0_64] : memref<16x128xf32, #tpu.memory_space<vmem>>, vector<16x128xf32>
    tpu.vector_store %arg7[%c0_63, %c0_64], %130 {strides = array<i32>} : memref<16x128xf32, #tpu.memory_space<vmem>>, vector<16x128xf32>,
    return
  }
  func.func @transform_0(%arg0: i32) -> (i32, i32, i32) {
    %c0_i32 = arith.constant 0 : i32
    %c0_i32_0 = arith.constant 0 : i32
    %c0_i32_1 = arith.constant 0 : i32
    return %c0_i32, %arg0, %c0_i32_0 : i32, i32, i32
  }
  func.func @transform_1(%arg0: i32) -> (i32, i32) {
    %c0_i32 = arith.constant 0 : i32
    %c0_i32_0 = arith.constant 0 : i32
    %c0_i32_1 = arith.constant 0 : i32
    return %c0_i32, %c0_i32_0 : i32, i32
  }
  func.func @transform_2(%arg0: i32) -> (i32, i32) {
    %c0_i32 = arith.constant 0 : i32
    %c0_i32_0 = arith.constant 0 : i32
    %c0_i32_1 = arith.constant 0 : i32
    return %c0_i32, %c0_i32_0 : i32, i32
  }
  func.func @transform_3(%arg0: i32) -> (i32, i32) {
    %c0_i32 = arith.constant 0 : i32
    %c0_i32_0 = arith.constant 0 : i32
    %c0_i32_1 = arith.constant 0 : i32
    return %c0_i32, %c0_i32_0 : i32, i32
  }
  func.func @transform_4(%arg0: i32) -> (i32, i32) {
    %c0_i32 = arith.constant 0 : i32
    %c0_i32_0 = arith.constant 0 : i32
    %c0_i32_1 = arith.constant 0 : i32
    return %c0_i32, %c0_i32_0 : i32, i32
  }
  func.func @transform_5(%arg0: i32) -> (i32, i32) {
    %c0_i32 = arith.constant 0 : i32
    %c0_i32_0 = arith.constant 0 : i32
    %c0_i32_1 = arith.constant 0 : i32
    return %c0_i32, %c0_i32_0 : i32, i32
  }
  func.func @transform_6(%arg0: i32) -> (i32, i32) {
    %c0_i32 = arith.constant 0 : i32
    %c0_i32_0 = arith.constant 0 : i32
    return %arg0, %c0_i32 : i32, i32
  }
}

</mosaic_0001>

<bundles_post_ra>
// kernel: tpu_custom_call.1
= control target key start
LH: loop header
LB: loop body
LE: loop exit
PB: predicated region body
PF: predicated region fallthrough
CT: control target
= control target key end

     0   :  { %11 = vsyncpa [#allocation4], 0  ;;  %s1833_s0 = inlined_call_operand.hbm [shape: bf16[8,16,128], index: 0, kind: input, shape index: {}]   ;;  %s1834_s1 = inlined_call_operand.hbm [shape: bf16[128,128], index: 1, kind: input, shape index: {}]   ;;  %s1835_s2 = inlined_call_operand.vmem [shape: f32[1,128], index: 2, kind: input, shape index: {}]   ;;  %s1836_s3 = inlined_call_operand.hbm [shape: bf16[128,128], index: 3, kind: input, shape index: {}]   ;;  %s1837_s4 = inlined_call_operand.hbm [shape: bf16[128,128], index: 4, kind: input, shape index: {}]   ;;  %s1838_s5 = inlined_call_operand.vmem [shape: f32[1,128], index: 5, kind: input, shape index: {}]   ;;  %s1839_s6 = inlined_call_operand.hbm [shape: f32[16,128], index: 6, kind: output, shape index: {}]  }
   0x1   :  { %12 = vsyncpa [#allocation7], 0 }
   0x2   :  { %13 = vsyncpa [#allocation10], 0 }
   0x3   :  { %14 = vsyncpa [#allocation5], 0  ;;  %s1472_s21 = smov [#allocation6]   ;;  %s1473_s23 = smov [#allocation3]  }
   0x4   :  { %s32_s22 = sshll.u32 %s1472_s21, 4  ;;  %s20_s24 = sshll.u32 %s1473_s23, 4  ;;  %s33_s22 = int_to_ptr.vmem [resolvable:$true] %s32_s22  ;;  %s1519_s24 = int_to_ptr.vmem [resolvable:$true] %s20_s24 }
   0x5   :  { %s1354_s27 = scalar_lea.hbm %s1834_s1, 1024 }
   0x6   :  { %p1355_p0 = scmp.ne.s32.totalorder %s1834_s1, %s1354_s27  ;;  %p1358_p1 = scmp.lt.u32.totalorder %s1354_s27, %s1834_s1 }
   0x8   :  { %p1360_p2 = pnand %p1358_p1, %p1355_p0 }
   0xa   :  { %1363 = shalt.err (!%p1360_p2)
}
   0xb   :  { %s1364_s8 = scalar_lea.vmem %s33_s22, 1024  ;;  %p1369_p4 = scmp.lt.s32.totalorder %s33_s22, %s33_s22 }
   0xc   :  { %p1365_p3 = scmp.ne.s32.totalorder %s33_s22, %s1364_s8  ;;  %p1370_p5 = scmp.lt.s32.totalorder %s1364_s8, %s1364_s8 }
   0xe   :  { %p1371_p6 = por %p1370_p5, %p1369_p4 }
  0x10   :  { %p1372_p7 = pnand %p1371_p6, %p1365_p3 }
  0x12   :  { %1375 = shalt.err (!%p1372_p7)
}
  0x13   :  { %s1474_s9 = smov 64   ;;  %s1475_s10 = smov 4  }
  0x14   :  { %38 = dma.hbm_to_vmem [thread:$0]  %s1834_s1, 1024, %s33_s22, [#allocation7], %s1474_s9, %s1474_s9, %s1475_s10  }
  0x15   :  { %s1376_s15 = scalar_lea.hbm %s1833_s0, 1024 }
  0x16   :  { %p1377_p8 = scmp.ne.s32.totalorder %s1833_s0, %s1376_s15  ;;  %p1380_p9 = scmp.lt.u32.totalorder %s1376_s15, %s1833_s0 }
  0x18   :  { %p1382_p10 = pnand %p1380_p9, %p1377_p8 }
  0x1a   :  { %1385 = shalt.err (!%p1382_p10)
}
  0x1b   :  { %s1386_s20 = scalar_lea.vmem %s1519_s24, 1024  ;;  %p1391_p12 = scmp.lt.s32.totalorder %s1519_s24, %s1519_s24 }
  0x1c   :  { %p1387_p11 = scmp.ne.s32.totalorder %s1519_s24, %s1386_s20  ;;  %p1392_p13 = scmp.lt.s32.totalorder %s1386_s20, %s1386_s20 }
  0x1e   :  { %p1393_p0 = por %p1392_p13, %p1391_p12 }
  0x20   :  { %p1394_p1 = pnand %p1393_p0, %p1387_p11 }
  0x22   :  { %1397 = shalt.err (!%p1394_p1)
}
  0x23   :  { %26 = dma.hbm_to_vmem [thread:$0]  %s1833_s0, 1024, %s1519_s24, [#allocation4], %s1474_s9, %s1474_s9, %s1475_s10  }
  0x24   :  { %s1476_s22 = smov [#allocation8]   ;;  %s1477_s25 = smov [#allocation9]  }
  0x25   :  { %s46_s23 = sshll.u32 %s1476_s22, 4  ;;  %s58_s26 = sshll.u32 %s1477_s25, 4  ;;  %s47_s23 = int_to_ptr.vmem [resolvable:$true] %s46_s23  ;;  %s1556_s26 = int_to_ptr.vmem [resolvable:$true] %s58_s26 }
  0x26   :  { %s1398_s29 = scalar_lea.hbm %s1836_s3, 1024 }
  0x27   :  { %p1399_p2 = scmp.ne.s32.totalorder %s1836_s3, %s1398_s29  ;;  %p1402_p3 = scmp.lt.u32.totalorder %s1398_s29, %s1836_s3 }
  0x29   :  { %p1404_p4 = pnand %p1402_p3, %p1399_p2 }
  0x2b   :  { %1407 = shalt.err (!%p1404_p4)
}
  0x2c   :  { %s1408_s0 = scalar_lea.vmem %s47_s23, 1024  ;;  %p1413_p6 = scmp.lt.s32.totalorder %s47_s23, %s47_s23 }
  0x2d   :  { %p1409_p5 = scmp.ne.s32.totalorder %s47_s23, %s1408_s0  ;;  %p1414_p7 = scmp.lt.s32.totalorder %s1408_s0, %s1408_s0 }
  0x2f   :  { %p1415_p8 = por %p1414_p7, %p1413_p6 }
  0x31   :  { %p1416_p9 = pnand %p1415_p8, %p1409_p5 }
  0x33   :  { %1419 = shalt.err (!%p1416_p9)
}
  0x34   :  { %52 = dma.hbm_to_vmem [thread:$0]  %s1836_s3, 1024, %s47_s23, [#allocation7], %s1474_s9, %s1474_s9, %s1475_s10  }
  0x35   :  { %s1420_s15 = scalar_lea.hbm %s1837_s4, 1024 }
  0x36   :  { %p1421_p10 = scmp.ne.s32.totalorder %s1837_s4, %s1420_s15  ;;  %p1424_p11 = scmp.lt.u32.totalorder %s1420_s15, %s1837_s4 }
  0x38   :  { %p1426_p12 = pnand %p1424_p11, %p1421_p10 }
  0x3a   :  { %1429 = shalt.err (!%p1426_p12)
}
  0x3b   :  { %s1430_s20 = scalar_lea.vmem %s1556_s26, 1024  ;;  %p1435_p0 = scmp.lt.s32.totalorder %s1556_s26, %s1556_s26 }
  0x3c   :  { %p1431_p13 = scmp.ne.s32.totalorder %s1556_s26, %s1430_s20  ;;  %p1436_p1 = scmp.lt.s32.totalorder %s1430_s20, %s1430_s20 }
  0x3e   :  { %p1437_p2 = por %p1436_p1, %p1435_p0 }
  0x40   :  { %p1438_p3 = pnand %p1437_p2, %p1431_p13 }
  0x42   :  { %1441 = shalt.err (!%p1438_p3)
}
  0x43   :  { %64 = dma.hbm_to_vmem [thread:$0]  %s1837_s4, 1024, %s1556_s26, [#allocation10], %s1474_s9, %s1474_s9, %s1475_s10  }
  0x44   :  { %1464 = dma.done.wait [#allocation4], 1024  }
  0x45   :  { %1465 = vsyncadd [#allocation4], 4294966272 }
  0x46   :  { %1466 = dma.done.wait [#allocation7], 2048  }
  0x47   :  { %1467 = vsyncadd [#allocation7], 4294965248 }
  0x48   :  { %1468 = dma.done.wait [#allocation10], 1024  }
  0x49   :  { %1469 = vsyncadd [#allocation10], 4294966272  ;;  %v1478_v0 = vmov 0.0   ;;  %vm1479_vm0 = vmmov 0   ;;  %v1290_v1 = vld [vmem:[#allocation6] sm:$0xff]   ;;  %v1291_v2 = vld [vmem:[#allocation6 + $0x8] sm:$0xff]   ;;  %v312_v36 = vlaneseq }
  0x4a   :  { %1098 = vmatprep.subr.bf16.mxu1 %v1478_v0  ;;  %1114 = vmatprep.mubr.msk.bf16.mxu1 %vm1479_vm0, %v1478_v0  ;;  %v1292_v3 = vld [vmem:[#allocation6 + $0x10] sm:$0xff]   ;;  %v1596_v4 = vld [vmem:[#allocation8] sm:$0xff]   ;;  %v1293_v5 = vld [vmem:[#allocation6 + $0x18] sm:$0xff]   ;;  %v1480_v22 = vmov 0   ;;  %s1481_s21 = smov [#allocation11]  }
  0x4b   :  { %1066 = vmatprep.subr.bf16.mxu0 %v1290_v1  ;;  %1099 = vmatpush3.bf16.msra.mxu1 %v1596_v4  ;;  %v1599_v6 = vld [vmem:[#allocation8 + $0x8] sm:$0xff]   ;;  %v1300_v7 = vld [vmem:[#allocation3] sm:$0xff]   ;;  %v1603_v9 = vld [vmem:[#allocation8 + $0x10] sm:$0xff]   ;;  %v313_v46 = vand.u32 127, %v312_v36  ;;  %s921_s22 = sshll.u32 %s1481_s21, 4  ;;  %s922_s22 = int_to_ptr.vmem [resolvable:$true] %s921_s22 }
  0x4c   :  { %1067 = vmatpush3.bf16.msra.mxu0 %v1290_v1  ;;  %1100 = vmatprep.subr.bf16.mxu1 %v1478_v0  ;;  %v1294_v8 = vld [vmem:[#allocation6 + $0x20] sm:$0xff]   ;;  %v1295_v10 = vld [vmem:[#allocation6 + $0x28] sm:$0xff]   ;;  %v1607_v11 = vld [vmem:[#allocation8 + $0x18] sm:$0xff]   ;;  %s1442_s23 = scalar_lea.vmem %s922_s22, 256  ;;  %p1447_p5 = scmp.lt.s32.totalorder %s922_s22, %s922_s22 }
  0x4d   :  { %1068 = vmatprep.subr.bf16.mxu0 %v1291_v2  ;;  %1082 = vmatprep.mubr.bf16.mxu0 %v1300_v7  ;;  %v1296_v12 = vld [vmem:[#allocation6 + $0x30] sm:$0xff]   ;;  %v1611_v13 = vld [vmem:[#allocation8 + $0x20] sm:$0xff]   ;;  %v1298_v14 = vld [vmem:[#allocation6 + $0x38] sm:$0xff]   ;;  %vm314_vm1 = vcmp.lt.s32.totalorder %v313_v46, 32  ;;  %p1443_p4 = scmp.ne.s32.totalorder %s922_s22, %s1442_s23  ;;  %p1448_p6 = scmp.lt.s32.totalorder %s1442_s23, %s1442_s23 }
  0x4e   :  { %v1614_v15 = vld [vmem:[#allocation8 + $0x28] sm:$0xff]   ;;  %v1619_v16 = vld [vmem:[#allocation8 + $0x30] sm:$0xff]   ;;  %v1624_v19 = vld [vmem:[#allocation8 + $0x38] sm:$0xff]  }
  0x4f   :  { %1101 = vmatpush3.bf16.msra.mxu1 %v1599_v6  ;;  %v1301_v17 = vld [vmem:[#allocation3 + $0x8] sm:$0xff]   ;;  %v1304_v18 = vld [vmem:[#allocation3 + $0x10] sm:$0xff]   ;;  %v1305_v20 = vld [vmem:[#allocation3 + $0x18] sm:$0xff]   ;;  %p1449_p7 = por %p1448_p6, %p1447_p5 }
  0x50   :  { %1069 = vmatpush3.bf16.msra.mxu0 %v1291_v2  ;;  %1102 = vmatprep.subr.bf16.mxu1 %v1478_v0  ;;  %v1308_v21 = vld [vmem:[#allocation3 + $0x20] sm:$0xff]   ;;  %v1309_v23 = vld [vmem:[#allocation3 + $0x28] sm:$0xff]   ;;  %v1312_v24 = vld [vmem:[#allocation3 + $0x30] sm:$0xff]  }
  0x51   :  { %1070 = vmatprep.subr.bf16.mxu0 %v1292_v3  ;;  %v1313_v25 = vld [vmem:[#allocation3 + $0x38] sm:$0xff]   ;;  %v935_v26 = vld [vmem:[%s1835_s2] ss:$0 sm:$0xff]  ;;  %p1450_p8 = pnand %p1449_p7, %p1443_p4 }
  0x53   :  { %1103 = vmatpush3.bf16.msra.mxu1 %v1603_v9 }
  0x54   :  { %1071 = vmatpush3.bf16.msra.mxu0 %v1292_v3  ;;  %1104 = vmatprep.subr.bf16.mxu1 %v1478_v0 }
  0x55   :  { %1072 = vmatprep.subr.bf16.mxu0 %v1293_v5 }
  0x57   :  { %1105 = vmatpush3.bf16.msra.mxu1 %v1607_v11 }
  0x58   :  { %1073 = vmatpush3.bf16.msra.mxu0 %v1293_v5  ;;  %1106 = vmatprep.subr.bf16.mxu1 %v1478_v0 }
  0x59   :  { %1074 = vmatprep.subr.bf16.mxu0 %v1294_v8 }
  0x5b   :  { %1107 = vmatpush3.bf16.msra.mxu1 %v1611_v13 }
  0x5c   :  { %1075 = vmatpush3.bf16.msra.mxu0 %v1294_v8  ;;  %1108 = vmatprep.subr.bf16.mxu1 %v1478_v0 }
  0x5d   :  { %1076 = vmatprep.subr.bf16.mxu0 %v1295_v10 }
  0x5f   :  { %1109 = vmatpush3.bf16.msra.mxu1 %v1614_v15 }
  0x60   :  { %1077 = vmatpush3.bf16.msra.mxu0 %v1295_v10  ;;  %1110 = vmatprep.subr.bf16.mxu1 %v1478_v0 }
  0x61   :  { %1078 = vmatprep.subr.bf16.mxu0 %v1296_v12 }
  0x63   :  { %1111 = vmatpush3.bf16.msra.mxu1 %v1619_v16 }
  0x64   :  { %1079 = vmatpush3.bf16.msra.mxu0 %v1296_v12  ;;  %1112 = vmatprep.subr.bf16.mxu1 %v1478_v0 }
  0x65   :  { %1080 = vmatprep.subr.bf16.mxu0 %v1298_v14 }
  0x67   :  { %1113 = vmatpush3.bf16.msra.mxu1 %v1624_v19 }
  0x68   :  { %1081 = vmatpush3.bf16.msra.mxu0 %v1298_v14  ;;  %1138 = vmatprep.subr.bf16.mxu1 %v1478_v0 }
  0x69   :  { %1118 = vmatprep.subr.bf16.mxu0 %v1478_v0 }
  0x6a   :  { %1115 = vmatmul.mubr.bf16.vlgmr.msra.gmra.mrb[0].mxu1 %v1480_v22 }
  0x6b   :  { %1083 = vmatmul.mubr.bf16.vlgmr.msra.gmra.mrb[0].mxu0 %v1301_v17  ;;  %1139 = vmatpush3.bf16.msra.mxu1 %v1596_v4 }
  0x6c   :  { %1086 = vmatprep.mubr.bf16.mxu0 %v1304_v18  ;;  %1119 = vmatpush3.bf16.msra.mxu0 %v1596_v4 }
  0x6d   :  { %1120 = vmatprep.subr.bf16.mxu0 %v1478_v0  ;;  %1154 = vmatprep.mubr.msk.bf16.mxu1 %vm1479_vm0, %v1478_v0 }
  0x6e   :  { %1140 = vmatprep.subr.bf16.mxu1 %v1478_v0 }
  0x6f   :  { %1141 = vmatpush3.bf16.msra.mxu1 %v1599_v6 }
  0x70   :  { %1121 = vmatpush3.bf16.msra.mxu0 %v1599_v6  ;;  %1142 = vmatprep.subr.bf16.mxu1 %v1478_v0 }
  0x71   :  { %1122 = vmatprep.subr.bf16.mxu0 %v1478_v0 }
  0x73   :  { %1087 = vmatmul.mubr.bf16.gmra.mrb[4].mxu0 %v1305_v20  ;;  %1143 = vmatpush3.bf16.msra.mxu1 %v1603_v9 }
  0x74   :  { %1090 = vmatprep.mubr.bf16.mxu0 %v1308_v21  ;;  %1123 = vmatpush3.bf16.msra.mxu0 %v1603_v9 }
  0x75   :  { %1124 = vmatprep.subr.bf16.mxu0 %v1478_v0  ;;  %1144 = vmatprep.subr.bf16.mxu1 %v1478_v0 }
  0x77   :  { %1145 = vmatpush3.bf16.msra.mxu1 %v1607_v11 }
  0x78   :  { %1125 = vmatpush3.bf16.msra.mxu0 %v1607_v11  ;;  %1146 = vmatprep.subr.bf16.mxu1 %v1478_v0 }
  0x79   :  { %1126 = vmatprep.subr.bf16.mxu0 %v1478_v0 }
  0x7b   :  { %1091 = vmatmul.mubr.bf16.gmra.mrb[8].mxu0 %v1309_v23  ;;  %1147 = vmatpush3.bf16.msra.mxu1 %v1611_v13 }
  0x7c   :  { %1094 = vmatprep.mubr.bf16.mxu0 %v1312_v24  ;;  %1127 = vmatpush3.bf16.msra.mxu0 %v1611_v13 }
  0x7d   :  { %1128 = vmatprep.subr.bf16.mxu0 %v1478_v0  ;;  %1148 = vmatprep.subr.bf16.mxu1 %v1478_v0 }
  0x7f   :  { %1149 = vmatpush3.bf16.msra.mxu1 %v1614_v15 }
  0x80   :  { %1129 = vmatpush3.bf16.msra.mxu0 %v1614_v15  ;;  %1150 = vmatprep.subr.bf16.mxu1 %v1478_v0 }
  0x81   :  { %1130 = vmatprep.subr.bf16.mxu0 %v1478_v0 }
  0x83   :  { %1095 = vmatmul.mubr.bf16.gmra.mrb[12].mxu0 %v1313_v25  ;;  %1151 = vmatpush3.bf16.msra.mxu1 %v1619_v16 }
  0x84   :  { %1131 = vmatpush3.bf16.msra.mxu0 %v1619_v16  ;;  %1134 = vmatprep.mubr.msk.bf16.mxu0 %vm1479_vm0, %v1478_v0 }
  0x85   :  { %1132 = vmatprep.subr.bf16.mxu0 %v1478_v0  ;;  %1152 = vmatprep.subr.bf16.mxu1 %v1478_v0 }
  0x87   :  { %1153 = vmatpush3.bf16.msra.mxu1 %v1624_v19 }
  0x88   :  { %1133 = vmatpush3.bf16.msra.mxu0 %v1624_v19  ;;  %1178 = vmatprep.subr.bf16.mxu1 %v1478_v0 }
  0x89   :  { %1158 = vmatprep.subr.bf16.mxu0 %v1478_v0 }
 0x13d   :  { %v454_v33 = vpop.f32.mrb[0].mxu1 }
 0x13e   :  { %v1084_v27 = vpop.f32.mrb[0].mxu0  ;;  %v1116_v34 = vpop.f32.mrb[1].mxu1 }
 0x13f   :  { %v258_v28 = vadd.f32 %v1084_v27, %v935_v26  ;;  %v249_v29 = vpop.f32.mrb[1].mxu0  ;;  %v457_v37 = vpop.f32.mrb[2].mxu1 }
 0x140   :  { %v1085_v30 = vpop.f32.mrb[2].mxu0  ;;  %v1117_v40 = vpop.f32.mrb[3].mxu1  ;;  %v250_v1 = vadd.f32 %v935_v26, %v249_v29 }
 0x141   :  { %v261_v31 = vadd.f32 %v1085_v30, %v935_v26  ;;  %v252_v32 = vpop.f32.mrb[3].mxu0 }
 0x142   :  { %v253_v8 = vadd.f32 %v935_v26, %v252_v32 }
 0x146   :  { %v1088_v35 = vpop.f32.mrb[4].mxu0 }
 0x147   :  { %v274_v38 = vadd.f32 %v1088_v35, %v935_v26  ;;  %v265_v39 = vpop.f32.mrb[5].mxu0 }
 0x148   :  { %v266_v41 = vadd.f32 %v935_v26, %v265_v39  ;;  %v1089_v42 = vpop.f32.mrb[6].mxu0 }
 0x149   :  { %v277_v43 = vadd.f32 %v1089_v42, %v935_v26  ;;  %v268_v44 = vpop.f32.mrb[7].mxu0 }
 0x14a   :  { %v269_v45 = vadd.f32 %v935_v26, %v268_v44 }
 0x14e   :  { %v1092_v47 = vpop.f32.mrb[8].mxu0 }
 0x14f   :  { %v290_v48 = vadd.f32 %v1092_v47, %v935_v26  ;;  %v281_v49 = vpop.f32.mrb[9].mxu0 }
 0x150   :  { %v282_v50 = vadd.f32 %v935_v26, %v281_v49  ;;  %v1093_v51 = vpop.f32.mrb[10].mxu0 }
 0x151   :  { %v293_v52 = vadd.f32 %v1093_v51, %v935_v26  ;;  %v284_v53 = vpop.f32.mrb[11].mxu0  ;;  %v1669_v54 = vsel %vm314_vm1, %v266_v41, %v290_v48  ;;  %v1672_v55 = vsel %vm314_vm1, %v290_v48, %v266_v41 }
 0x152   :  { %v285_v56 = vadd.f32 %v935_v26, %v284_v53  ;;  %v1675_v57 = vsel %vm314_vm1, %v274_v38, %v282_v50  ;;  %v1678_v58 = vsel %vm314_vm1, %v282_v50, %v274_v38 }
 0x153   :  { %v1681_v59 = vsel %vm314_vm1, %v269_v45, %v293_v52  ;;  %v1684_v60 = vsel %vm314_vm1, %v293_v52, %v269_v45 }
 0x154   :  { %v1687_v61 = vsel %vm314_vm1, %v277_v43, %v285_v56  ;;  %v1690_v62 = vsel %vm314_vm1, %v285_v56, %v277_v43 }
 0x156   :  { %v1096_v63 = vpop.f32.mrb[12].mxu0 }
 0x157   :  { %v306_v2 = vadd.f32 %v1096_v63, %v935_v26  ;;  %v297_v3 = vpop.f32.mrb[13].mxu0 }
 0x158   :  { %v298_v5 = vadd.f32 %v935_v26, %v297_v3  ;;  %v1097_v7 = vpop.f32.mrb[14].mxu0 }
 0x159   :  { %v315_v10 = vsel %vm314_vm1, %v250_v1, %v306_v2  ;;  %v309_v12 = vadd.f32 %v1097_v7, %v935_v26  ;;  %v300_v14 = vpop.f32.mrb[15].mxu0  ;;  %v1694_v17 = vsel %vm314_vm1, %v306_v2, %v250_v1 }
 0x15a   :  { %v461_v18 = vadd.f32 %v454_v33, %v315_v10  ;;  %v301_v20 = vadd.f32 %v935_v26, %v300_v14  ;;  %v319_v21 = vsel %vm314_vm1, %v258_v28, %v298_v5  ;;  %v1698_v22 = vsel %vm314_vm1, %v298_v5, %v258_v28 }
 0x15b   :  { %v316_v23 = vsel %vm314_vm1, %v253_v8, %v309_v12  ;;  %v1702_v24 = vsel %vm314_vm1, %v309_v12, %v253_v8 }
 0x15c   :  { %v462_v25 = vadd.f32 %v457_v37, %v316_v23  ;;  %v320_v27 = vsel %vm314_vm1, %v261_v31, %v301_v20  ;;  %v1706_v29 = vsel %vm314_vm1, %v301_v20, %v261_v31  ;;  %1322 = vtanh.f32 %v461_v18 }
 0x15e   :  { %1324 = vtanh.f32 %v462_v25 }
 0x166   :  { %v1323_v30 = vpop.eup %1322 }
 0x168   :  { %v1325_v26 = vpop.eup %1324 }
 0x169   :  { %v467_v32 = vpack.c.bf16 %v1325_v26, %v1323_v30 }
 0x16b   :  { %1135 = vmatmul.mubr.bf16.vlgmr.msra.gmra.mrb[16].mxu0 %v467_v32  ;;  %v1318_v32 = vld [vmem:[#allocation9 + $0x20] sm:$0xff]  }
 0x16c   :  { %1159 = vmatpush3.bf16.msra.mxu0 %v1596_v4  ;;  %1174 = vmatprep.mubr.msk.bf16.mxu0 %vm1479_vm0, %v1478_v0 }
 0x16d   :  { %1160 = vmatprep.subr.bf16.mxu0 %v1478_v0 }
 0x170   :  { %1161 = vmatpush3.bf16.msra.mxu0 %v1599_v6 }
 0x171   :  { %1162 = vmatprep.subr.bf16.mxu0 %v1478_v0 }
 0x174   :  { %1163 = vmatpush3.bf16.msra.mxu0 %v1603_v9 }
 0x175   :  { %1164 = vmatprep.subr.bf16.mxu0 %v1478_v0 }
 0x178   :  { %1165 = vmatpush3.bf16.msra.mxu0 %v1607_v11 }
 0x179   :  { %1166 = vmatprep.subr.bf16.mxu0 %v1478_v0 }
 0x17c   :  { %1167 = vmatpush3.bf16.msra.mxu0 %v1611_v13 }
 0x17d   :  { %1168 = vmatprep.subr.bf16.mxu0 %v1478_v0 }
 0x180   :  { %1169 = vmatpush3.bf16.msra.mxu0 %v1614_v15 }
 0x181   :  { %1170 = vmatprep.subr.bf16.mxu0 %v1478_v0 }
 0x184   :  { %1171 = vmatpush3.bf16.msra.mxu0 %v1619_v16 }
 0x185   :  { %1172 = vmatprep.subr.bf16.mxu0 %v1478_v0 }
 0x188   :  { %1173 = vmatpush3.bf16.msra.mxu0 %v1624_v19 }
 0x189   :  { %1198 = vmatprep.subr.bf16.mxu0 %v1478_v0 }
 0x23e   :  { %v502_v28 = vpop.f32.mrb[16].mxu0 }
 0x23f   :  { %v509_v31 = vadd.f32 %v502_v28, %v319_v21  ;;  %v1136_v33 = vpop.f32.mrb[17].mxu0  ;;  %v1319_v28 = vld [vmem:[#allocation9 + $0x28] sm:$0xff]  }
 0x240   :  { %v505_v34 = vpop.f32.mrb[18].mxu0 }
 0x241   :  { %v510_v35 = vadd.f32 %v505_v34, %v320_v27  ;;  %v1137_v36 = vpop.f32.mrb[19].mxu0  ;;  %1326 = vtanh.f32 %v509_v31  ;;  %v1320_v31 = vld [vmem:[#allocation9 + $0x30] sm:$0xff]  }
 0x243   :  { %1328 = vtanh.f32 %v510_v35 }
 0x24b   :  { %v1327_v37 = vpop.eup %1326 }
 0x24d   :  { %v1329_v38 = vpop.eup %1328 }
 0x24e   :  { %v515_v39 = vpack.c.bf16 %v1329_v38, %v1327_v37 }
 0x250   :  { %1155 = vmatmul.mubr.bf16.vlgmr.msra.gmra.mrb[4].mxu1 %v515_v39 }
 0x251   :  { %1179 = vmatpush3.bf16.msra.mxu1 %v1596_v4  ;;  %1194 = vmatprep.mubr.msk.bf16.mxu1 %vm1479_vm0, %v1478_v0 }
 0x252   :  { %1180 = vmatprep.subr.bf16.mxu1 %v1478_v0 }
 0x255   :  { %1181 = vmatpush3.bf16.msra.mxu1 %v1599_v6 }
 0x256   :  { %1182 = vmatprep.subr.bf16.mxu1 %v1478_v0 }
 0x259   :  { %1183 = vmatpush3.bf16.msra.mxu1 %v1603_v9 }
 0x25a   :  { %1184 = vmatprep.subr.bf16.mxu1 %v1478_v0 }
 0x25d   :  { %1185 = vmatpush3.bf16.msra.mxu1 %v1607_v11 }
 0x25e   :  { %1186 = vmatprep.subr.bf16.mxu1 %v1478_v0 }
 0x261   :  { %1187 = vmatpush3.bf16.msra.mxu1 %v1611_v13 }
 0x262   :  { %1188 = vmatprep.subr.bf16.mxu1 %v1478_v0 }
 0x265   :  { %1189 = vmatpush3.bf16.msra.mxu1 %v1614_v15 }
 0x266   :  { %1190 = vmatprep.subr.bf16.mxu1 %v1478_v0 }
 0x269   :  { %1191 = vmatpush3.bf16.msra.mxu1 %v1619_v16 }
 0x26a   :  { %1192 = vmatprep.subr.bf16.mxu1 %v1478_v0 }
 0x26d   :  { %1193 = vmatpush3.bf16.msra.mxu1 %v1624_v19 }
 0x26e   :  { %1218 = vmatprep.subr.bf16.mxu1 %v1478_v0 }
 0x323   :  { %v550_v40 = vpop.f32.mrb[4].mxu1 }
 0x324   :  { %v557_v41 = vadd.f32 %v550_v40, %v1669_v54  ;;  %v1156_v42 = vpop.f32.mrb[5].mxu1 }
 0x325   :  { %v553_v43 = vpop.f32.mrb[6].mxu1 }
 0x326   :  { %v558_v44 = vadd.f32 %v553_v43, %v1681_v59  ;;  %v1157_v45 = vpop.f32.mrb[7].mxu1  ;;  %1330 = vtanh.f32 %v557_v41  ;;  %v960_v41 = vld [vmem:[%s1838_s5] ss:$0 sm:$0xff] }
 0x328   :  { %1332 = vtanh.f32 %v558_v44 }
 0x330   :  { %v1331_v46 = vpop.eup %1330 }
 0x332   :  { %v1333_v47 = vpop.eup %1332 }
 0x333   :  { %v563_v48 = vpack.c.bf16 %v1333_v47, %v1331_v46 }
 0x335   :  { %1175 = vmatmul.mubr.bf16.vlgmr.msra.gmra.mrb[20].mxu0 %v563_v48 }
 0x336   :  { %1199 = vmatpush3.bf16.msra.mxu0 %v1596_v4  ;;  %1214 = vmatprep.mubr.msk.bf16.mxu0 %vm1479_vm0, %v1478_v0 }
 0x337   :  { %1200 = vmatprep.subr.bf16.mxu0 %v1478_v0 }
 0x33a   :  { %1201 = vmatpush3.bf16.msra.mxu0 %v1599_v6 }
 0x33b   :  { %1202 = vmatprep.subr.bf16.mxu0 %v1478_v0 }
 0x33e   :  { %1203 = vmatpush3.bf16.msra.mxu0 %v1603_v9 }
 0x33f   :  { %1204 = vmatprep.subr.bf16.mxu0 %v1478_v0 }
 0x342   :  { %1205 = vmatpush3.bf16.msra.mxu0 %v1607_v11 }
 0x343   :  { %1206 = vmatprep.subr.bf16.mxu0 %v1478_v0 }
 0x346   :  { %1207 = vmatpush3.bf16.msra.mxu0 %v1611_v13 }
 0x347   :  { %1208 = vmatprep.subr.bf16.mxu0 %v1478_v0 }
 0x34a   :  { %1209 = vmatpush3.bf16.msra.mxu0 %v1614_v15 }
 0x34b   :  { %1210 = vmatprep.subr.bf16.mxu0 %v1478_v0 }
 0x34e   :  { %1211 = vmatpush3.bf16.msra.mxu0 %v1619_v16 }
 0x34f   :  { %1212 = vmatprep.subr.bf16.mxu0 %v1478_v0 }
 0x352   :  { %1213 = vmatpush3.bf16.msra.mxu0 %v1624_v19 }
 0x353   :  { %1238 = vmatprep.subr.bf16.mxu0 %v1478_v0 }
 0x408   :  { %v598_v49 = vpop.f32.mrb[20].mxu0 }
 0x409   :  { %v605_v50 = vadd.f32 %v598_v49, %v1675_v57  ;;  %v1176_v51 = vpop.f32.mrb[21].mxu0 }
 0x40a   :  { %v601_v52 = vpop.f32.mrb[22].mxu0 }
 0x40b   :  { %v606_v53 = vadd.f32 %v601_v52, %v1687_v61  ;;  %v1177_v54 = vpop.f32.mrb[23].mxu0  ;;  %1334 = vtanh.f32 %v605_v50 }
 0x40d   :  { %1336 = vtanh.f32 %v606_v53 }
 0x415   :  { %v1335_v56 = vpop.eup %1334 }
 0x417   :  { %v1337_v59 = vpop.eup %1336 }
 0x418   :  { %v611_v63 = vpack.c.bf16 %v1337_v59, %v1335_v56 }
 0x41a   :  { %1195 = vmatmul.mubr.bf16.vlgmr.msra.gmra.mrb[8].mxu1 %v611_v63 }
 0x41b   :  { %1219 = vmatpush3.bf16.msra.mxu1 %v1596_v4  ;;  %1234 = vmatprep.mubr.msk.bf16.mxu1 %vm1479_vm0, %v1478_v0 }
 0x41c   :  { %1220 = vmatprep.subr.bf16.mxu1 %v1478_v0 }
 0x41f   :  { %1221 = vmatpush3.bf16.msra.mxu1 %v1599_v6 }
 0x420   :  { %1222 = vmatprep.subr.bf16.mxu1 %v1478_v0 }
 0x423   :  { %1223 = vmatpush3.bf16.msra.mxu1 %v1603_v9 }
 0x424   :  { %1224 = vmatprep.subr.bf16.mxu1 %v1478_v0 }
 0x427   :  { %1225 = vmatpush3.bf16.msra.mxu1 %v1607_v11 }
 0x428   :  { %1226 = vmatprep.subr.bf16.mxu1 %v1478_v0 }
 0x42b   :  { %1227 = vmatpush3.bf16.msra.mxu1 %v1611_v13 }
 0x42c   :  { %1228 = vmatprep.subr.bf16.mxu1 %v1478_v0 }
 0x42f   :  { %1229 = vmatpush3.bf16.msra.mxu1 %v1614_v15 }
 0x430   :  { %1230 = vmatprep.subr.bf16.mxu1 %v1478_v0 }
 0x433   :  { %1231 = vmatpush3.bf16.msra.mxu1 %v1619_v16 }
 0x434   :  { %1232 = vmatprep.subr.bf16.mxu1 %v1478_v0 }
 0x437   :  { %1233 = vmatpush3.bf16.msra.mxu1 %v1624_v19 }
 0x438   :  { %1258 = vmatprep.subr.bf16.mxu1 %v1478_v0 }
 0x4ed   :  { %v646_v57 = vpop.f32.mrb[8].mxu1 }
 0x4ee   :  { %v653_v61 = vadd.f32 %v646_v57, %v1678_v58  ;;  %v1196_v1 = vpop.f32.mrb[9].mxu1 }
 0x4ef   :  { %v649_v2 = vpop.f32.mrb[10].mxu1 }
 0x4f0   :  { %v654_v3 = vadd.f32 %v649_v2, %v1690_v62  ;;  %v1197_v5 = vpop.f32.mrb[11].mxu1  ;;  %1338 = vtanh.f32 %v653_v61 }
 0x4f2   :  { %1340 = vtanh.f32 %v654_v3 }
 0x4fa   :  { %v1339_v7 = vpop.eup %1338 }
 0x4fc   :  { %v1341_v8 = vpop.eup %1340 }
 0x4fd   :  { %v659_v10 = vpack.c.bf16 %v1341_v8, %v1339_v7 }
 0x4ff   :  { %1215 = vmatmul.mubr.bf16.vlgmr.msra.gmra.mrb[24].mxu0 %v659_v10 }
 0x500   :  { %1239 = vmatpush3.bf16.msra.mxu0 %v1596_v4  ;;  %1254 = vmatprep.mubr.msk.bf16.mxu0 %vm1479_vm0, %v1478_v0 }
 0x501   :  { %1240 = vmatprep.subr.bf16.mxu0 %v1478_v0 }
 0x504   :  { %1241 = vmatpush3.bf16.msra.mxu0 %v1599_v6 }
 0x505   :  { %1242 = vmatprep.subr.bf16.mxu0 %v1478_v0 }
 0x508   :  { %1243 = vmatpush3.bf16.msra.mxu0 %v1603_v9 }
 0x509   :  { %1244 = vmatprep.subr.bf16.mxu0 %v1478_v0 }
 0x50c   :  { %1245 = vmatpush3.bf16.msra.mxu0 %v1607_v11 }
 0x50d   :  { %1246 = vmatprep.subr.bf16.mxu0 %v1478_v0 }
 0x510   :  { %1247 = vmatpush3.bf16.msra.mxu0 %v1611_v13 }
 0x511   :  { %1248 = vmatprep.subr.bf16.mxu0 %v1478_v0 }
 0x514   :  { %1249 = vmatpush3.bf16.msra.mxu0 %v1614_v15 }
 0x515   :  { %1250 = vmatprep.subr.bf16.mxu0 %v1478_v0 }
 0x518   :  { %1251 = vmatpush3.bf16.msra.mxu0 %v1619_v16  ;;  %v1314_v16 = vld [vmem:[#allocation9] sm:$0xff]  }
 0x519   :  { %1252 = vmatprep.subr.bf16.mxu0 %v1478_v0 }
 0x51c   :  { %1253 = vmatpush3.bf16.msra.mxu0 %v1624_v19  ;;  %v1315_v19 = vld [vmem:[#allocation9 + $0x8] sm:$0xff]  }
 0x5d2   :  { %v694_v4 = vpop.f32.mrb[24].mxu0 }
 0x5d3   :  { %v701_v6 = vadd.f32 %v694_v4, %v1672_v55  ;;  %v1216_v9 = vpop.f32.mrb[25].mxu0  ;;  %v1316_v55 = vld [vmem:[#allocation9 + $0x10] sm:$0xff]  }
 0x5d4   :  { %v697_v11 = vpop.f32.mrb[26].mxu0 }
 0x5d5   :  { %v702_v58 = vadd.f32 %v697_v11, %v1684_v60  ;;  %v1217_v13 = vpop.f32.mrb[27].mxu0  ;;  %1342 = vtanh.f32 %v701_v6  ;;  %v1317_v60 = vld [vmem:[#allocation9 + $0x18] sm:$0xff]  }
 0x5d7   :  { %1344 = vtanh.f32 %v702_v58 }
 0x5df   :  { %v1343_v62 = vpop.eup %1342 }
 0x5e1   :  { %v1345_v15 = vpop.eup %1344 }
 0x5e2   :  { %v707_v12 = vpack.c.bf16 %v1345_v15, %v1343_v62 }
 0x5e4   :  { %1235 = vmatmul.mubr.bf16.vlgmr.msra.gmra.mrb[12].mxu1 %v707_v12 }
 0x5e5   :  { %1274 = vmatprep.mubr.msk.bf16.mxu1 %vm1479_vm0, %v1478_v0  ;;  %1259 = vmatpush3.bf16.msra.mxu1 %v1314_v16 }
 0x5e6   :  { %1260 = vmatprep.subr.bf16.mxu1 %v1478_v0 }
 0x5e9   :  { %1261 = vmatpush3.bf16.msra.mxu1 %v1315_v19 }
 0x5ea   :  { %1262 = vmatprep.subr.bf16.mxu1 %v1478_v0 }
 0x5ed   :  { %1263 = vmatpush3.bf16.msra.mxu1 %v1316_v55 }
 0x5ee   :  { %1264 = vmatprep.subr.bf16.mxu1 %v1478_v0 }
 0x5f1   :  { %1265 = vmatpush3.bf16.msra.mxu1 %v1317_v60 }
 0x5f2   :  { %1266 = vmatprep.subr.bf16.mxu1 %v1478_v0 }
 0x5f5   :  { %1267 = vmatpush3.bf16.msra.mxu1 %v1318_v32 }
 0x5f6   :  { %1268 = vmatprep.subr.bf16.mxu1 %v1478_v0 }
 0x5f9   :  { %1269 = vmatpush3.bf16.msra.mxu1 %v1319_v28 }
 0x5fa   :  { %1270 = vmatprep.subr.bf16.mxu1 %v1478_v0 }
 0x5fd   :  { %1271 = vmatpush3.bf16.msra.mxu1 %v1320_v31 }
 0x5fe   :  { %1272 = vmatprep.subr.bf16.mxu1 %v1478_v0 }
 0x6b7   :  { %v742_v14 = vpop.f32.mrb[12].mxu1 }
 0x6b8   :  { %v749_v18 = vadd.f32 %v742_v14, %v1698_v22  ;;  %v1236_v20 = vpop.f32.mrb[13].mxu1  ;;  %v1321_v22 = vld [vmem:[#allocation9 + $0x38] sm:$0xff]  }
 0x6b9   :  { %v745_v21 = vpop.f32.mrb[14].mxu1  ;;  %1273 = vmatpush3.bf16.msra.mxu1 %v1321_v22 }
 0x6ba   :  { %v750_v23 = vadd.f32 %v745_v21, %v1706_v29  ;;  %v1237_v25 = vpop.f32.mrb[15].mxu1  ;;  %1346 = vtanh.f32 %v749_v18 }
 0x6bc   :  { %1348 = vtanh.f32 %v750_v23 }
 0x6c4   :  { %v1347_v27 = vpop.eup %1346 }
 0x6c6   :  { %v1349_v30 = vpop.eup %1348 }
 0x6c7   :  { %v755_v26 = vpack.c.bf16 %v1349_v30, %v1347_v27 }
 0x6c9   :  { %1255 = vmatmul.mubr.bf16.vlgmr.msra.gmra.mrb[28].mxu0 %v755_v26 }
 0x79c   :  { %v790_v29 = vpop.f32.mrb[28].mxu0 }
 0x79d   :  { %v797_v33 = vadd.f32 %v790_v29, %v1694_v17  ;;  %v1256_v34 = vpop.f32.mrb[29].mxu0 }
 0x79e   :  { %v793_v35 = vpop.f32.mrb[30].mxu0 }
 0x79f   :  { %v798_v36 = vadd.f32 %v793_v35, %v1702_v24  ;;  %v1257_v37 = vpop.f32.mrb[31].mxu0  ;;  %1350 = vtanh.f32 %v797_v33 }
 0x7a1   :  { %1352 = vtanh.f32 %v798_v36 }
 0x7a9   :  { %v1351_v38 = vpop.eup %1350 }
 0x7ab   :  { %v1353_v39 = vpop.eup %1352 }
 0x7ac   :  { %v801_v40 = vpack.c.bf16 %v1353_v39, %v1351_v38 }
 0x7ae   :  { %1275 = vmatmul.mubr.bf16.vlgmr.msra.gmra.mrb[16].mxu1 %v801_v40 }
 0x881   :  { %v907_v0 = vpop.f32.mrb[16].mxu1 }
 0x882   :  { %v908_v42 = vadd.f32 %v960_v41, %v907_v0  ;;  %v1276_v17 = vpop.f32.mrb[17].mxu1 }
 0x883   :  { %v910_v43 = vpop.f32.mrb[18].mxu1 }
 0x884   :  { %914 = vst [vmem:[#allocation11] sm:$0xff] %v908_v42  ;;  %v911_v24 = vadd.f32 %v960_v41, %v910_v43  ;;  %v1277_v44 = vpop.f32.mrb[19].mxu1 }
 0x886   :  { %915 = vst [vmem:[#allocation11 + $0x8] sm:$0xff] %v911_v24 }
 0x887   :  { %1453 = shalt.err (!%p1450_p8)
}
 0x888   :  { %s1454_s26 = scalar_lea.hbm %s1839_s6, 256 }
 0x889   :  { %p1455_p9 = scmp.ne.s32.totalorder %s1839_s6, %s1454_s26  ;;  %p1458_p10 = scmp.lt.u32.totalorder %s1454_s26, %s1839_s6 }
 0x88b   :  { %p1460_p11 = pnand %p1458_p10, %p1455_p9 }
 0x88d   :  { %1463 = shalt.err (!%p1460_p11)
}
 0x88e   :  { %s1482_s7 = smov 128   ;;  %s1483_s8 = smov 8  }
 0x88f   :  { %927 = dma.vmem_to_hbm [thread:$0]  %s922_s22, 256, %s1839_s6, [#allocation5], %s1482_s7, %s1482_s7, %s1483_s8  }
 0x890   :  { %1470 = dma.done.wait [#allocation5], 256  }
 0x891   :  { %1471 = vsyncadd [#allocation5], 4294967040 }
 0x892   :  { %931 = vsyncpa [#allocation4], 1 }
 0x893   :  { %932 = vsyncpa [#allocation7], 1 }
 0x894   :  { %933 = vsyncpa [#allocation10], 1 }
 0x895   :  { %934 = vsyncpa [#allocation5], 1 }

</bundles_post_ra>
